<compile_context>
chip_gen: v6e
topology: v6e:2x2x1
jax: 0.10.0
libtpu: 0.0.40
codegen_flags: <defaults>
</compile_context>

<pallas_src>
import jax
import jax.numpy as jnp
from jax import lax
from jax.experimental import pallas as pl
from jax.experimental.pallas import tpu as pltpu


def _round_up(x, m):
    return ((x + m - 1) // m) * m


def encoder_kernel(bidx_ref, s_ref, out_ref):
    """One batch tile: 3-way gather from the folded score column + sigmoid.

    bidx_ref : (3, TB)   i32 VMEM  row indices into s (pre-offset per modality)
    s_ref    : (NTOT, 1) f32 VMEM  folded per-entity scores (grid-invariant)
    out_ref  : (1, TB)   f32 VMEM  sigmoid scores, batch on the lane axis
    """
    ntot = s_ref.shape[0]
    tb = out_ref.shape[1]

    idx = bidx_ref[...]                                      # (3, TB) i32
    row = lax.broadcasted_iota(jnp.int32, (ntot, tb), 0)     # row id per (row, lane)
    # Combined one-hot.  The three per-modality index ranges are disjoint after
    # offsetting, so OR never merges two live hits for a valid lane.  Padded
    # batch lanes carry zeros (alias row 0) and are sliced off by the wrapper.
    hot = ((row == idx[0:1, :])
           | (row == idx[1:2, :])
           | (row == idx[2:3, :]))                           # (NTOT, TB) bool
    # VPU mask-multiply + XLU cross-sublane reduce; no MXU push for an M=1 GEMV.
    contrib = jnp.where(hot, s_ref[...], jnp.float32(0.0))   # (NTOT, TB)
    logit = jnp.sum(contrib, axis=0, keepdims=True)          # (1, TB)
    out_ref[...] = jax.nn.sigmoid(logit)


def precompute_entity_scores(x_drug, x_target, x_disease, params):
    """Once-per-model fold (hoisted off the per-forward critical path).

    Folds encode_i and fc through the feature tables:
      s[n] = x_n @ (W_m @ wfc_m)   for entity n of modality m,
    with the scalar bias c = b1@wfc1 + b2@wfc2 + b3@wfc3 + bfc folded into the
    disease entries (every valid batch row hits exactly one disease row).
    Returns the [NTOT, 1] f32 score column and (ND, NT, NS).
    """
    W1, b1, W2, b2, W3, b3, Wfc, bfc = params
    E, H = W1.shape
    f32 = jnp.float32

    wf1, wf2, wf3 = Wfc[:H], Wfc[H:2 * H], Wfc[2 * H:]            # [H, 1] each
    v1, v2, v3 = W1 @ wf1, W2 @ wf2, W3 @ wf3                     # [E, 1] each
    c = (b1 @ wf1[:, 0] + b2 @ wf2[:, 0] + b3 @ wf3[:, 0] + bfc[0]).astype(f32)

    s_drug = x_drug.astype(f32) @ v1.astype(f32)                  # [ND, 1]
    s_target = x_target.astype(f32) @ v2.astype(f32)              # [NT, 1]
    s_disease = x_disease.astype(f32) @ v3.astype(f32) + c        # [NS, 1]
    s_col = jnp.concatenate([s_drug, s_target, s_disease], axis=0)  # [NTOT, 1]
    sizes = (x_drug.shape[0], x_target.shape[0], x_disease.shape[0])
    return s_col.astype(f32), sizes


def encoder_forward(batch_data, s_col, sizes, block_b=512):
    """batch_data: [B, 3] int indices (drug, target, disease). Returns score [B]."""
    ND, NT, NS = sizes
    NTOT = ND + NT + NS
    B = batch_data.shape[0]

    # Batch tile: multiple of 128 lanes, large enough to amortize grid-step
    # overhead, shrunk for tiny batches so we don't pad 8 -> 512.
    TB = max(128, min(_round_up(block_b, 128), _round_up(B, 128)))
    B_pad = _round_up(B, TB)

    # Offset each modality's index into the concatenated score column; batch on
    # lanes.  Padded lanes carry zero indices (all alias row 0) -> finite
    # garbage scores that are sliced off below; never reduce over padded lanes.
    offs = jnp.array([0, ND, ND + NT], jnp.int32)
    idx = batch_data.astype(jnp.int32) + offs[None, :]            # [B, 3]
    bidx = jnp.zeros((3, B_pad), jnp.int32).at[:, :B].set(idx.T)  # [3, B_pad]

    grid = (B_pad // TB,)
    out = pl.pallas_call(
        encoder_kernel,
        out_shape=jax.ShapeDtypeStruct((1, B_pad), jnp.float32),
        grid=grid,
        in_specs=[
            pl.BlockSpec((3, TB), lambda i: (0, i)),          # batch-index tile
            pl.BlockSpec((NTOT, 1), lambda i: (0, 0)),        # folded scores (grid-invariant)
        ],
        out_specs=pl.BlockSpec((1, TB), lambda i: (0, i)),    # lane-dense scores
        compiler_params=pltpu.CompilerParams(
            dimension_semantics=("parallel",),                # >=2 tiles -> both TCs on v7x
            vmem_limit_bytes=32 * 1024 * 1024),               # v5e scoped default is 16 MiB
    )(bidx, s_col)
    return out[0, :B]                                         # torch .squeeze()


def embedding_bag_mean(table, inputs, offsets):
    """nn.EmbeddingBag(mode='mean'): bag i = mean(table[inputs[off[i]:off[i+1]]])."""
    # TODO(synk): ragged data-dependent pooling kept as plain-JAX glue (get_feature()).
    L = inputs.shape[0]
    nbags = offsets.shape[0]
    gathered = table[inputs]                                                # [L, E]
    seg = jnp.sum(jnp.arange(L)[:, None] >= offsets[None, :], axis=1) - 1   # bag id per index
    sums = jnp.zeros((nbags, table.shape[1]), table.dtype).at[seg].add(gathered)
    counts = jnp.zeros((nbags,), table.dtype).at[seg].add(1.0)
    return sums / jnp.maximum(counts, 1.0)[:, None]                         # empty-bag guard


if __name__ == "__main__":
    key = jax.random.PRNGKey(0)
    E, H = 32, 32                       # embSize, hiddenSize
    num_drug, num_target, num_disease = 6, 5, 7
    B = 8
    keys = jax.random.split(key, 12)

    def xavier(k, shape):
        fan_in, fan_out = shape
        std = (2.0 / (fan_in + fan_out)) ** 0.5
        return std * jax.random.normal(k, shape, jnp.float32)

    # Embedding tables (nn.EmbeddingBag(1024,E), nn.EmbeddingBag(26,E), nn.Embedding(nd,E))
    emb_fp = jax.random.normal(keys[0], (1024, E), jnp.float32)
    emb_xt = jax.random.normal(keys[1], (26, E), jnp.float32)
    emb_dis = jax.random.normal(keys[2], (num_disease, E), jnp.float32)

    # Linear params stored as [in, out] (xavier_normal_ is symmetric); biases = 0.
    W1 = xavier(keys[3], (E, H)); b1 = jnp.zeros((H,), jnp.float32)
    W2 = xavier(keys[4], (E, H)); b2 = jnp.zeros((H,), jnp.float32)
    W3 = xavier(keys[5], (E, H)); b3 = jnp.zeros((H,), jnp.float32)
    Wfc = xavier(keys[6], (3 * H, 1)); bfc = jnp.zeros((1,), jnp.float32)

    # Synthetic EmbeddingBag inputs (drug fingerprints / target sequences) + offsets.
    drug_input = jax.random.randint(keys[7], (4 * num_drug,), 0, 1024)
    drug_offset = jnp.arange(num_drug) * 4
    target_input = jax.random.randint(keys[8], (6 * num_target,), 0, 26)
    target_offset = jnp.arange(num_target) * 6
    disease_idx = jnp.arange(num_disease)

    # get_feature(): gather/pool in JAX glue.
    x_drug = embedding_bag_mean(emb_fp, drug_input, drug_offset)          # [num_drug, E]
    x_target = embedding_bag_mean(emb_xt, target_input, target_offset)    # [num_target, E]
    x_disease = emb_dis[disease_idx]                                      # [num_disease, E]

    # batch_data: [B, 3] int indices (drug, target, disease).
    batch_data = jnp.stack([
        jax.random.randint(keys[9], (B,), 0, num_drug),
        jax.random.randint(keys[10], (B,), 0, num_target),
        jax.random.randint(keys[11], (B,), 0, num_disease),
    ], axis=1)

    params = (W1, b1, W2, b2, W3, b3, Wfc, bfc)

    # Once-per-model parameter/table fold (hoisted out of the forward path).
    s_col, sizes = precompute_entity_scores(x_drug, x_target, x_disease, params)

    score = jax.block_until_ready(encoder_forward(batch_data, s_col, sizes))

    # Pure-JAX reference of the ORIGINAL (unfused) forward for correctness.
    xd_b = x_drug[batch_data[:, 0]]
    xt_b = x_target[batch_data[:, 1]]
    xs_b = x_disease[batch_data[:, 2]]
    h1 = xd_b @ W1 + b1
    h2 = xt_b @ W2 + b2
    h3 = xs_b @ W3 + b3
    ref = jax.nn.sigmoid(jnp.concatenate([h1, h2, h3], axis=1) @ Wfc + bfc)[:, 0]

    assert score.shape == (B,), score.shape
    assert jnp.allclose(score, ref, atol=1e-5), (score, ref)

    print("KERNEL_OK")
</pallas_src>

<mosaic_0001>
module attributes {stable_mosaic.version = 11 : i64} {
  func.func @encoder_kernel(%arg0: i32, %arg1: memref<3x128xi32, #tpu.memory_space<vmem>>, %arg2: memref<18x1xf32, #tpu.memory_space<vmem>>, %arg3: memref<1x128xf32, #tpu.memory_space<vmem>>) attributes {dimension_semantics = [#tpu.dimension_semantics<parallel>], iteration_bounds = array<i64: 1>, scalar_prefetch = 0 : i64, scratch_operands = 0 : i64, tpu.core_type = #tpu.core_type<tc>, window_params = [{transform_indices = @transform_0, window_bounds = array<i64: 3, 128>}, {pipeline_mode = #tpu.pipeline_mode<synchronous>, transform_indices = @transform_1, window_bounds = array<i64: 18, 1>}, {transform_indices = @transform_2, window_bounds = array<i64: 1, 128>}]} {
    %c0 = arith.constant 0 : index
    %c0_0 = arith.constant 0 : index
    %0 = vector.load %arg1[%c0, %c0_0] : memref<3x128xi32, #tpu.memory_space<vmem>>, vector<3x128xi32>
    %1 = tpu.iota {dimensions = array<i32: 0>} : vector<18x128xi32>
    %2 = vector.extract_strided_slice %0 {offsets = [0, 0], sizes = [1, 128], strides = [1, 1]} : vector<3x128xi32> to vector<1x128xi32>
    %3 = vector.broadcast %2 : vector<1x128xi32> to vector<18x128xi32>
    %4 = arith.cmpi eq, %1, %3 : vector<18x128xi32>
    %5 = vector.extract_strided_slice %0 {offsets = [1, 0], sizes = [1, 128], strides = [1, 1]} : vector<3x128xi32> to vector<1x128xi32>
    %6 = vector.broadcast %5 : vector<1x128xi32> to vector<18x128xi32>
    %7 = arith.cmpi eq, %1, %6 : vector<18x128xi32>
    %8 = arith.ori %4, %7 : vector<18x128xi1>
    %9 = vector.extract_strided_slice %0 {offsets = [2, 0], sizes = [1, 128], strides = [1, 1]} : vector<3x128xi32> to vector<1x128xi32>
    %10 = vector.broadcast %9 : vector<1x128xi32> to vector<18x128xi32>
    %11 = arith.cmpi eq, %1, %10 : vector<18x128xi32>
    %12 = arith.ori %8, %11 : vector<18x128xi1>
    %c0_1 = arith.constant 0 : index
    %c0_2 = arith.constant 0 : index
    %13 = vector.load %arg2[%c0_1, %c0_2] : memref<18x1xf32, #tpu.memory_space<vmem>>, vector<18x1xf32>
    %cst = arith.constant 0.000000e+00 : f32
    %14 = vector.shape_cast %13 : vector<18x1xf32> to vector<18x1xf32>
    %15 = vector.broadcast %14 : vector<18x1xf32> to vector<18x128xf32>
    %16 = vector.broadcast %cst : f32 to vector<18x128xf32>
    %17 = arith.select %12, %15, %16 : vector<18x128xi1>, vector<18x128xf32>
    %cst_3 = arith.constant dense<0.000000e+00> : vector<128xf32>
    %18 = vector.multi_reduction <add>, %17, %cst_3 [0] : vector<18x128xf32> to vector<128xf32>
    %19 = vector.shape_cast %18 : vector<128xf32> to vector<1x128xf32>
    %20 = arith.negf %19 : vector<1x128xf32>
    %21 = math.exp %20 : vector<1x128xf32>
    %cst_4 = arith.constant 1.000000e+00 : f32
    %22 = vector.broadcast %cst_4 : f32 to vector<1x128xf32>
    %23 = arith.addf %22, %21 : vector<1x128xf32>
    %24 = arith.divf %22, %23 : vector<1x128xf32>
    %c0_5 = arith.constant 0 : index
    %c0_6 = arith.constant 0 : index
    %25 = vector.load %arg3[%c0_5, %c0_6] : memref<1x128xf32, #tpu.memory_space<vmem>>, vector<1x128xf32>
    tpu.vector_store %arg3[%c0_5, %c0_6], %24 {strides = array<i32>} : memref<1x128xf32, #tpu.memory_space<vmem>>, vector<1x128xf32>,
    return
  }
  func.func @transform_0(%arg0: i32) -> (i32, i32) {
    %c0_i32 = arith.constant 0 : i32
    %c0_i32_0 = arith.constant 0 : i32
    return %c0_i32, %arg0 : i32, i32
  }
  func.func @transform_1(%arg0: i32) -> (i32, i32) {
    %c0_i32 = arith.constant 0 : i32
    %c0_i32_0 = arith.constant 0 : i32
    %c0_i32_1 = arith.constant 0 : i32
    return %c0_i32, %c0_i32_0 : i32, i32
  }
  func.func @transform_2(%arg0: i32) -> (i32, i32) {
    %c0_i32 = arith.constant 0 : i32
    %c0_i32_0 = arith.constant 0 : i32
    return %c0_i32, %arg0 : i32, i32
  }
}

</mosaic_0001>

<bundles_post_ra>
// kernel: tpu_custom_call.1
= control target key start
LH: loop header
LB: loop body
LE: loop exit
PB: predicated region body
PF: predicated region fallthrough
CT: control target
= control target key end

     0   :  { %v127_v2 = vmov 0   ;;  %s159_s0 = inlined_call_operand.vmem [shape: s32[3,128], index: 0, kind: input, shape index: {}]   ;;  %s160_s1 = inlined_call_operand.vmem [shape: f32[18,1], index: 1, kind: input, shape index: {}]   ;;  %s161_s2 = inlined_call_operand.hbm [shape: f32[1,128], index: 2, kind: output, shape index: {}]  }
   0x1   :  { %v44_v0 = vld [vmem:[%s160_s1] sm:$0xff]  ;;  %v46_v1 = vld [vmem:[%s160_s1 + $0x10] sm:$0x3]  ;;  %99 = vset.pattern.permute.xlu0 %v127_v2  ;;  %100 = vset.pattern.permute.xlu1 %v127_v2 }
   0x2   :  { %7 = vsyncpa [#allocation3], 0  ;;  %49 = vperm.xlu0 %99, %v44_v0   ;;  %59 = vperm.xlu1 %100, %v46_v1   ;;  %v45_v3 = vld [vmem:[%s160_s1 + $0x8] sm:$0xff]  ;;  %v13_v4 = vlaneseq  ;;  %v12_v8 = vld [vmem:[%s159_s0] sm:$0x7]  ;;  %vm66_vm15 = vcmask 1041408  }
   0x3   :  { %s128_s0 = smov [#allocation2]  }
   0x4   :  { %v14_v5 = vshrl.u32 %v13_v4, 7  ;;  %s88_s1 = sshll.u32 %s128_s0, 4  ;;  %s89_s1 = int_to_ptr.vmem [resolvable:$true] %s88_s1 }
   0x5   :  { %s105_s17 = scalar_lea.vmem %s89_s1, 16  ;;  %s109_s18 = scalar_lea.vmem %s89_s1, 32 }
   0x6   :  { %54 = vperm.xlu0 %99, %v45_v3   ;;  %v19_v6 = vsub.s32 0, %v14_v5  ;;  %v26_v7 = vsub.s32 1, %v14_v5  ;;  %v16_v9 = vadd.s32 16, %v14_v5  ;;  %v36_v12 = vsub.s32 2, %v14_v5  ;;  %p106_p0 = scmp.ne.s32.totalorder %s89_s1, %s105_s17  ;;  %p110_p1 = scmp.lt.s32.totalorder %s89_s1, %s89_s1 }
   0x7   :  { %v15_v13 = vadd.s32 8, %v14_v5  ;;  %p111_p2 = scmp.lt.s32.totalorder %s109_s18, %s105_s17 }
   0x8   :  { %v20_v10 = vrot.slane %v12_v8, %v19_v6  ;;  %v27_v11 = vrot.slane %v12_v8, %v26_v7  ;;  %v37_v14 = vrot.slane %v12_v8, %v36_v12 }
   0x9   :  { %p112_p3 = por %p111_p2, %p110_p1 }
   0xa   :  { %vm23_vm0 = vcmp.eq.s32.totalorder %v16_v9, %v20_v10  ;;  %vm30_vm1 = vcmp.eq.s32.totalorder %v16_v9, %v27_v11  ;;  %vm21_vm2 = vcmp.eq.s32.totalorder %v14_v5, %v20_v10  ;;  %vm28_vm3 = vcmp.eq.s32.totalorder %v14_v5, %v27_v11 }
   0xb   :  { %vm22_vm4 = vcmp.eq.s32.totalorder %v15_v13, %v20_v10  ;;  %vm29_vm5 = vcmp.eq.s32.totalorder %v15_v13, %v27_v11  ;;  %vm33_vm6 = vmor %vm23_vm0, %vm30_vm1  ;;  %vm40_vm7 = vcmp.eq.s32.totalorder %v16_v9, %v37_v14  ;;  %vm38_vm9 = vcmp.eq.s32.totalorder %v14_v5, %v37_v14  ;;  %p113_p4 = pnand %p112_p3, %p106_p0 }
   0xc   :  { %vm31_vm8 = vmor %vm21_vm2, %vm28_vm3  ;;  %vm39_vm11 = vcmp.eq.s32.totalorder %v15_v13, %v37_v14 }
   0xd   :  { %vm32_vm10 = vmor %vm22_vm4, %vm29_vm5 }
   0xe   :  { %vm43_vm12 = vmor %vm33_vm6, %vm40_vm7 }
   0xf   :  { %vm41_vm13 = vmor %vm31_vm8, %vm38_vm9 }
  0x10   :  { %vm42_vm14 = vmor %vm32_vm10, %vm39_vm11 }
  0x7d   :  { %v50_v15 = vpop.permute.xlu0 %49  ;;  %v60_v16 = vpop.permute.xlu1 %59 }
  0x7e   :  { %v64_v17 = vsel %vm43_vm12, %v60_v16, 0.0  ;;  %v62_v19 = vsel %vm41_vm13, %v50_v15, 0.0 }
  0x7f   :  { %v67_v21 = vsel %vm66_vm15, %v64_v17, 0.0 }
  0x81   :  { %v55_v18 = vpop.permute.xlu0 %54 }
  0x82   :  { %v63_v20 = vsel %vm42_vm14, %v55_v18, 0.0 }
  0x83   :  { %v65_v22 = vadd.f32 %v63_v20, %v62_v19 }
  0x85   :  { %v68_v23 = vadd.f32 %v67_v21, %v65_v22 }
  0x87   :  { %v69_v24 = vrot.slane %v68_v23, 4 }
  0x89   :  { %v70_v25 = vadd.f32 %v69_v24, %v68_v23 }
  0x8b   :  { %v71_v26 = vrot.slane %v70_v25, 2 }
  0x8d   :  { %v72_v27 = vadd.f32 %v71_v26, %v70_v25 }
  0x8f   :  { %v73_v28 = vrot.slane %v72_v27, 1 }
  0x91   :  { %v74_v29 = vadd.f32 %v73_v28, %v72_v27 }
  0x93   :  { %v96_v30 = vmul.f32 -1.442695, %v74_v29 }
  0x95   :  { %101 = vpow2.f32 %v96_v30 }
  0xa2   :  { %v102_v31 = vpop.eup %101 }
  0xa3   :  { %v78_v32 = vadd.f32 1.0, %v102_v31 }
  0xa5   :  { %103 = vrcp.f32 %v78_v32 }
  0xb2   :  { %v104_v33 = vpop.eup %103 }
  0xb3   :  { %81 = vst [vmem:[#allocation2] sm:$0x1] %v104_v33 }
  0xb4   :  { %116 = shalt.err (!%p113_p4)
}
  0xb5   :  { %91 = dma.vmem_to_hbm [thread:$0]  %s89_s1, 16, %s161_s2, [#allocation3]  }
  0xb6   :  { %125 = dma.done.wait [#allocation3], 16  }
  0xb7   :  { %126 = vsyncadd [#allocation3], 4294967280 }
  0xb8   :  { %95 = vsyncpa [#allocation3], 1 }

</bundles_post_ra>
